<compile_context>
chip_gen: v7x
topology: tpu7x:2x2x1
jax: 0.10.0
libtpu: 0.0.40
codegen_flags: <defaults>
</compile_context>

<pallas_src>
import functools
import math

import jax
import jax.numpy as jnp
from jax.experimental import pallas as pl
from jax.experimental.pallas import tpu as pltpu

EPS = 1e-6
_TILE_TARGET_BYTES = 2 * 1024 * 1024    # target f32 bytes per row tile (two-pass path)
_VMEM_LIMIT_CACHE = None


def _vmem_limit_bytes():
    """Per-generation scoped-VMEM budget (~3/4 of physical VMEM)."""
    global _VMEM_LIMIT_CACHE
    if _VMEM_LIMIT_CACHE is None:
        try:
            cap = int(pltpu.get_tpu_info().vmem_capacity_bytes)
        except Exception:
            cap = 64 * 1024 * 1024       # conservative fallback (v7x-sized)
        _VMEM_LIMIT_CACHE = max(32 * 1024 * 1024, (cap * 3) // 4)
    return _VMEM_LIMIT_CACHE


def _choose_repack(C, HW):
    """Smallest k with (k*C) % 128 == 0; fall back to k = 1 if HW % k != 0."""
    k = 128 // math.gcd(C, 128)          # always a power of two
    if HW % k != 0:
        k = 1
    return k


def _fold_matrix(C, k):
    """(L, L) 0/1 matrix: F[i, j] = 1 iff lanes i and j hold the same channel."""
    chan = jnp.tile(jnp.arange(C, dtype=jnp.int32), k)            # (L,)
    return (chan[:, None] == chan[None, :]).astype(jnp.float32)   # (L, L)


# --------------------------- fused (per-batch) kernel ------------------------
def _grn_fused_kernel(*refs, k, eps):
    if k > 1:
        fold_ref, x_ref, g_ref, b_ref, o_ref = refs
    else:
        x_ref, g_ref, b_ref, o_ref = refs

    x = x_ref[...].astype(jnp.float32)                   # (1, R, L)
    s = jnp.sum(x * x, axis=1)                           # (1, L) per-lane sum sq
    if k > 1:
        # Per-channel totals broadcast back to every lane of the group (one
        # tiny MXU matmul; MXU is otherwise idle in this kernel).
        s = jnp.dot(s, fold_ref[...], preferred_element_type=jnp.float32)
    gx = jnp.sqrt(s)                                      # (1, L)
    # Each channel appears exactly k times across lanes, so the lane mean
    # equals the channel mean.
    mean = jnp.mean(gx, axis=-1, keepdims=True)           # (1, 1)
    nx = gx / (mean + eps)
    scale = 1.0 + g_ref[...] * nx                         # (1, L)
    o_ref[...] = (x * scale + b_ref[...]).astype(o_ref.dtype)


# --------------------------- two-pass kernels --------------------------------
def _grn_sumsq_kernel(x_ref, s_ref, *, rows, t_r):
    j = pl.program_id(1)

    @pl.when(j == 0)
    def _():
        s_ref[...] = jnp.zeros_like(s_ref)

    def _accum(mask_rows):
        x = x_ref[...].astype(jnp.float32)                # (1, t_r, L)
        if mask_rows:
            row = jax.lax.broadcasted_iota(jnp.int32, x.shape, 1)
            x = jnp.where(j * t_r + row < rows, x, 0.0)
        s_ref[...] += jnp.sum(x * x, axis=1, keepdims=True)

    if rows % t_r:
        last = pl.num_programs(1) - 1

        @pl.when(j != last)
        def _():
            _accum(False)

        @pl.when(j == last)                               # only last tile pays the mask
        def _():
            _accum(True)
    else:
        _accum(False)


def _grn_apply_kernel(scale_ref, bias_ref, x_ref, o_ref):
    # Pure VPU mul-add; Nx/scale are precomputed per batch outside the kernel.
    # Garbage rows of a ragged last tile are dropped by the OOB write.
    x = x_ref[...].astype(jnp.float32)                    # (1, t_r, L)
    o_ref[...] = (x * scale_ref[...] + bias_ref[...]).astype(o_ref.dtype)


# ----------------------------- public wrapper --------------------------------
def grn(x, gamma, beta, eps=EPS, *, block_rows=None, force_two_pass=False):
    """GRN forward.  x: (B, H, W, C) NHWC; gamma/beta: any shape with C elements."""
    B, H, W, C = x.shape
    HW = H * W
    gamma = jnp.asarray(gamma).reshape(-1).astype(jnp.float32)
    beta = jnp.asarray(beta).reshape(-1).astype(jnp.float32)
    assert gamma.shape == (C,) and beta.shape == (C,)

    # Lane-dense repack (free contiguous reshape): lane l holds channel l % C.
    k = _choose_repack(C, HW)
    L = C * k
    R = HW // k
    xv = x.reshape(B, R, L)
    g_l = jnp.tile(gamma, k).reshape(1, L)
    b_l = jnp.tile(beta, k).reshape(1, L)

    vmem_limit = _vmem_limit_bytes()
    elems = R * L
    slab_in = elems * x.dtype.itemsize
    slab_f32 = elems * 4
    fold_bytes = 2 * L * L * 4 if k > 1 else 0
    # Double-buffered native-dtype in/out blocks + f32 temps (+ fold matrix).
    fused_footprint = 4 * slab_in + 3 * slab_f32 + fold_bytes
    fused = (not force_two_pass) and fused_footprint <= (vmem_limit * 9) // 10

    if fused:
        in_arrays = [xv, g_l, b_l]
        in_specs = [
            pl.BlockSpec((1, R, L), lambda b: (b, 0, 0)),
            pl.BlockSpec((1, L), lambda b: (0, 0)),
            pl.BlockSpec((1, L), lambda b: (0, 0)),
        ]
        if k > 1:
            in_arrays = [_fold_matrix(C, k)] + in_arrays
            in_specs = [pl.BlockSpec((L, L), lambda b: (0, 0))] + in_specs
        out = pl.pallas_call(
            functools.partial(_grn_fused_kernel, k=k, eps=eps),
            out_shape=jax.ShapeDtypeStruct((B, R, L), x.dtype),
            grid_spec=pltpu.PrefetchScalarGridSpec(
                num_scalar_prefetch=0,
                grid=(B,),
                in_specs=in_specs,
                out_specs=pl.BlockSpec((1, R, L), lambda b: (b, 0, 0)),
            ),
            compiler_params=pltpu.CompilerParams(
                dimension_semantics=("parallel",),
                vmem_limit_bytes=vmem_limit,
            ),
        )(*in_arrays)
        return out.reshape(B, H, W, C)

    # ------------------------- two-pass path --------------------------------
    # v7x megacore helper: split each batch slab into two row halves so pass 1
    # has >= 2 "parallel" work units even when B == 1 (harmless on 1-TC chips).
    n_split = 2 if (R % 2 == 0 and R >= 16) else 1
    R1 = R // n_split
    xv1 = xv.reshape(B * n_split, R1, L)

    def _pick_tile(rows):
        if block_rows is None:
            t = (_TILE_TARGET_BYTES // (L * 4)) // 8 * 8
        else:
            t = (block_rows // 8) * 8
        t = max(8, t)
        if t >= rows:
            t = rows                     # full extent is always a legal block
        return t, pl.cdiv(rows, t)

    t_r1, n_r1 = _pick_tile(R1)
    t_r2, n_r2 = _pick_tile(R)

    # Pass 1: per-lane sum of squares (output-resident accumulator over rows).
    ssq = pl.pallas_call(
        functools.partial(_grn_sumsq_kernel, rows=R1, t_r=t_r1),
        out_shape=jax.ShapeDtypeStruct((B * n_split, 1, L), jnp.float32),
        grid_spec=pltpu.PrefetchScalarGridSpec(
            num_scalar_prefetch=0,
            grid=(B * n_split, n_r1),
            in_specs=[pl.BlockSpec((1, t_r1, L), lambda b, j: (b, j, 0))],
            out_specs=pl.BlockSpec((1, 1, L), lambda b, j: (b, 0, 0)),
        ),
        compiler_params=pltpu.CompilerParams(
            dimension_semantics=("parallel", "arbitrary"),
            vmem_limit_bytes=vmem_limit,
        ),
    )(xv1)

    # Tiny per-batch epilogue in plain JAX (hoisted out of the per-tile apply):
    # combine row-half partials, fold lane groups to channels, compute Nx/scale.
    s_chan = ssq.reshape(B, n_split, k, C).sum(axis=(1, 2))          # (B, C)
    gx = jnp.sqrt(s_chan)
    nx = gx / (jnp.mean(gx, axis=-1, keepdims=True) + eps)
    scale = jnp.tile(1.0 + gamma[None, :] * nx, (1, k)).reshape(B, 1, L)
    bias = b_l.reshape(1, 1, L)

    # Pass 2: pure elementwise mul-add over row tiles.
    # TODO(synk): sweep pipeline_mode=pl.Buffered(3) on the x BlockSpec if
    # profiling shows exposed DMA from simultaneous tile read + writeback.
    out = pl.pallas_call(
        _grn_apply_kernel,
        out_shape=jax.ShapeDtypeStruct((B, R, L), x.dtype),
        grid_spec=pltpu.PrefetchScalarGridSpec(
            num_scalar_prefetch=0,
            grid=(B, n_r2),
            in_specs=[
                pl.BlockSpec((1, 1, L), lambda b, j: (b, 0, 0)),
                pl.BlockSpec((1, 1, L), lambda b, j: (0, 0, 0)),
                pl.BlockSpec((1, t_r2, L), lambda b, j: (b, j, 0)),
            ],
            out_specs=pl.BlockSpec((1, t_r2, L), lambda b, j: (b, j, 0)),
        ),
        compiler_params=pltpu.CompilerParams(
            dimension_semantics=("parallel", "parallel"),
            vmem_limit_bytes=vmem_limit,
        ),
    )(scale.astype(jnp.float32), bias.astype(jnp.float32), xv)
    return out.reshape(B, H, W, C)


# ----------------------------- pure-JAX reference ----------------------------
def _ref_grn(x, gamma, beta, eps=EPS):
    xf = x.astype(jnp.float32)
    gx = jnp.sqrt(jnp.sum(xf * xf, axis=(1, 2), keepdims=True))      # (B,1,1,C)
    nx = gx / (jnp.mean(gx, axis=-1, keepdims=True) + eps)
    g = jnp.asarray(gamma).reshape(1, 1, 1, -1).astype(jnp.float32)
    b = jnp.asarray(beta).reshape(1, 1, 1, -1).astype(jnp.float32)
    return (g * (xf * nx) + b + xf).astype(x.dtype)


if __name__ == "__main__":
    key = jax.random.PRNGKey(0)

    cases = [
        # (name, (B, H, W, C), dtype, kwargs, atol, rtol)
        ("c4_fused",    (2, 16, 16, 4),   jnp.float32,  {},                                       5e-5, 1e-5),
        ("c32_fused",   (2, 16, 16, 32),  jnp.float32,  {},                                       5e-5, 1e-5),
        ("c48_fused",   (2, 8, 8, 48),    jnp.float32,  {},                                       5e-5, 1e-5),   # k=8, L=384 (MXU fold)
        ("c128_fused",  (2, 4, 4, 128),   jnp.float32,  {},                                       5e-5, 1e-5),   # k=1, no fold
        ("c48_twopass", (2, 12, 12, 48),  jnp.float32,  dict(force_two_pass=True, block_rows=8),  5e-5, 1e-5),   # ragged tiles + row-half split
        ("c48_nopack",  (1, 5, 5, 48),    jnp.float32,  dict(force_two_pass=True, block_rows=8),  5e-5, 1e-5),   # k=1 fallback, masked lanes
        ("c32_bf16",    (2, 16, 16, 32),  jnp.bfloat16, {},                                       3e-2, 3e-2),
    ]

    for idx, (name, shape, dtype, kw, atol, rtol) in enumerate(cases):
        B, H, W, C = shape
        ks = jax.random.split(jax.random.fold_in(key, idx), 3)
        x = jax.random.normal(ks[0], shape, dtype=jnp.float32).astype(dtype)
        # Module init is zeros (output == x); use deterministic non-trivial
        # synthetic values so the normalization/affine path is exercised.
        gamma = (0.5 + 0.1 * jax.random.normal(ks[1], (C,), dtype=jnp.float32)).reshape(1, 1, 1, C)
        beta = (0.1 * jax.random.normal(ks[2], (C,), dtype=jnp.float32)).reshape(1, 1, 1, C)

        y = jax.block_until_ready(grn(x, gamma, beta, **kw))
        ref = _ref_grn(x, gamma, beta)
        assert y.shape == ref.shape and y.dtype == ref.dtype, f"{name}: meta mismatch"
        assert jnp.allclose(y.astype(jnp.float32), ref.astype(jnp.float32),
                            atol=atol, rtol=rtol), f"{name}: value mismatch"

    print("KERNEL_OK")
</pallas_src>

<mosaic_0001>
module attributes {stable_mosaic.version = 11 : i64} {
  func.func @_grn_fused_kernel(%arg0: i32, %arg1: memref<128x128xf32, #tpu.memory_space<vmem>>, %arg2: memref<1x8x128xf32, #tpu.memory_space<vmem>>, %arg3: memref<1x128xf32, #tpu.memory_space<vmem>>, %arg4: memref<1x128xf32, #tpu.memory_space<vmem>>, %arg5: memref<1x8x128xf32, #tpu.memory_space<vmem>>) attributes {dimension_semantics = [#tpu.dimension_semantics<parallel>], iteration_bounds = array<i64: 2>, scalar_prefetch = 0 : i64, scratch_operands = 0 : i64, tpu.core_type = #tpu.core_type<tc>, window_params = [{pipeline_mode = #tpu.pipeline_mode<synchronous>, transform_indices = @transform_0, window_bounds = array<i64: 128, 128>}, {transform_indices = @transform_1, window_bounds = array<i64: 1, 8, 128>}, {pipeline_mode = #tpu.pipeline_mode<synchronous>, transform_indices = @transform_2, window_bounds = array<i64: 1, 128>}, {pipeline_mode = #tpu.pipeline_mode<synchronous>, transform_indices = @transform_3, window_bounds = array<i64: 1, 128>}, {transform_indices = @transform_4, window_bounds = array<i64: 1, 8, 128>}]} {
    %c0 = arith.constant 0 : index
    %c0_0 = arith.constant 0 : index
    %c0_1 = arith.constant 0 : index
    %0 = vector.load %arg2[%c0, %c0_0, %c0_1] : memref<1x8x128xf32, #tpu.memory_space<vmem>>, vector<1x8x128xf32>
    %1 = arith.mulf %0, %0 : vector<1x8x128xf32>
    %cst = arith.constant dense<0.000000e+00> : vector<1x128xf32>
    %2 = vector.multi_reduction <add>, %1, %cst [1] : vector<1x8x128xf32> to vector<1x128xf32>
    %c0_2 = arith.constant 0 : index
    %c0_3 = arith.constant 0 : index
    %3 = vector.load %arg1[%c0_2, %c0_3] : memref<128x128xf32, #tpu.memory_space<vmem>>, vector<128x128xf32>
    %cst_4 = arith.constant dense<0.000000e+00> : vector<1x128xf32>
    %4 = tpu.matmul %2, %3, %cst_4 {dimension_numbers = #tpu.dot_dimension_numbers<[1], [0], [0], [1], [0, 0, 1, 1], [], []>} : vector<1x128xf32>, vector<128x128xf32>, vector<1x128xf32> -> vector<1x128xf32>
    %5 = math.sqrt %4 : vector<1x128xf32>
    %cst_5 = arith.constant dense<0.000000e+00> : vector<1xf32>
    %6 = vector.multi_reduction <add>, %5, %cst_5 [1] : vector<1x128xf32> to vector<1xf32>
    %7 = vector.shape_cast %6 : vector<1xf32> to vector<1x1xf32>
    %cst_6 = arith.constant 1.280000e+02 : f32
    %8 = vector.broadcast %cst_6 : f32 to vector<1x1xf32>
    %9 = arith.divf %7, %8 : vector<1x1xf32>
    %cst_7 = arith.constant 9.99999997E-7 : f32
    %10 = vector.broadcast %cst_7 : f32 to vector<1x1xf32>
    %11 = arith.addf %9, %10 : vector<1x1xf32>
    %12 = vector.broadcast %11 : vector<1x1xf32> to vector<1x128xf32>
    %13 = arith.divf %5, %12 : vector<1x128xf32>
    %c0_8 = arith.constant 0 : index
    %c0_9 = arith.constant 0 : index
    %14 = vector.load %arg3[%c0_8, %c0_9] : memref<1x128xf32, #tpu.memory_space<vmem>>, vector<1x128xf32>
    %15 = arith.mulf %14, %13 : vector<1x128xf32>
    %cst_10 = arith.constant 1.000000e+00 : f32
    %16 = vector.broadcast %cst_10 : f32 to vector<1x128xf32>
    %17 = arith.addf %16, %15 : vector<1x128xf32>
    %18 = vector.shape_cast %17 : vector<1x128xf32> to vector<1x1x128xf32>
    %19 = vector.broadcast %18 : vector<1x1x128xf32> to vector<1x8x128xf32>
    %20 = arith.mulf %0, %19 : vector<1x8x128xf32>
    %c0_11 = arith.constant 0 : index
    %c0_12 = arith.constant 0 : index
    %21 = vector.load %arg4[%c0_11, %c0_12] : memref<1x128xf32, #tpu.memory_space<vmem>>, vector<1x128xf32>
    %22 = vector.shape_cast %21 : vector<1x128xf32> to vector<1x1x128xf32>
    %23 = vector.broadcast %22 : vector<1x1x128xf32> to vector<1x8x128xf32>
    %24 = arith.addf %20, %23 : vector<1x8x128xf32>
    %c0_13 = arith.constant 0 : index
    %c0_14 = arith.constant 0 : index
    %c0_15 = arith.constant 0 : index
    %25 = vector.load %arg5[%c0_13, %c0_14, %c0_15] : memref<1x8x128xf32, #tpu.memory_space<vmem>>, vector<1x8x128xf32>
    tpu.vector_store %arg5[%c0_13, %c0_14, %c0_15], %24 {strides = array<i32>} : memref<1x8x128xf32, #tpu.memory_space<vmem>>, vector<1x8x128xf32>,
    return
  }
  func.func @transform_0(%arg0: i32) -> (i32, i32) {
    %c0_i32 = arith.constant 0 : i32
    %c0_i32_0 = arith.constant 0 : i32
    %c0_i32_1 = arith.constant 0 : i32
    return %c0_i32, %c0_i32_0 : i32, i32
  }
  func.func @transform_1(%arg0: i32) -> (i32, i32, i32) {
    %c0_i32 = arith.constant 0 : i32
    %c0_i32_0 = arith.constant 0 : i32
    %c0_i32_1 = arith.constant 0 : i32
    return %arg0, %c0_i32, %c0_i32_0 : i32, i32, i32
  }
  func.func @transform_2(%arg0: i32) -> (i32, i32) {
    %c0_i32 = arith.constant 0 : i32
    %c0_i32_0 = arith.constant 0 : i32
    %c0_i32_1 = arith.constant 0 : i32
    return %c0_i32, %c0_i32_0 : i32, i32
  }
  func.func @transform_3(%arg0: i32) -> (i32, i32) {
    %c0_i32 = arith.constant 0 : i32
    %c0_i32_0 = arith.constant 0 : i32
    %c0_i32_1 = arith.constant 0 : i32
    return %c0_i32, %c0_i32_0 : i32, i32
  }
  func.func @transform_4(%arg0: i32) -> (i32, i32, i32) {
    %c0_i32 = arith.constant 0 : i32
    %c0_i32_0 = arith.constant 0 : i32
    %c0_i32_1 = arith.constant 0 : i32
    return %arg0, %c0_i32, %c0_i32_0 : i32, i32, i32
  }
}

</mosaic_0001>

<bundles_post_ra>
// kernel: tpu_custom_call.1
= control target key start
LH: loop header
LB: loop body
LE: loop exit
PB: predicated region body
PF: predicated region fallthrough
CT: control target
= control target key end

     0   :  { %9 = vsyncpa [#allocation3], 0  ;;  %s984_s0 = inlined_call_operand.hbm [shape: f32[128,128], index: 0, kind: input, shape index: {}]   ;;  %s985_s1 = inlined_call_operand.hbm [shape: f32[2,8,128], index: 1, kind: input, shape index: {}]   ;;  %s986_s2 = inlined_call_operand.vmem [shape: f32[1,128], index: 2, kind: input, shape index: {}]   ;;  %s987_s3 = inlined_call_operand.vmem [shape: f32[1,128], index: 3, kind: input, shape index: {}]   ;;  %s988_s4 = inlined_call_operand.hbm [shape: f32[2,8,128], index: 4, kind: output, shape index: {}]  }
   0x1   :  { %10 = vsyncpa [#allocation6], 0 }
   0x2   :  { %12 = vsyncpa [#allocation6 + $0x1], 0 }
   0x3   :  { %13 = vsyncpa [#allocation4], 0 }
   0x4   :  { %15 = vsyncpa [#allocation4 + $0x1], 0  ;;  %s773_s15 = smov 0   ;;  %s775_s16 = smov 0  }
   0x5   :  { %s777_s17 = smov 0   ;;  %s779_s18 = smov 0  }
   0x6 LB: > { %s794_s19 = sadd.s32 4294967295, %s738_s18   ;;  %s453_s20 = sadd.s32 4294967294, %s738_s18   ;;  %s738_s18 = sphi %s779_s18, %s1008_s18   ;;  %s734_s17 = sphi %s777_s17, %s1007_s17   ;;  %s730_s16 = sphi %s775_s16, %s1006_s16   ;;  %s726_s15 = sphi %s773_s15, %s1005_s15  }
   0x7   : > { %p62_p0 = scmp.ne.s32.totalorder %s730_s16, %s726_s15  ;;  %p989_p1 = scmp.eq.s32.totalorder %s794_s19, 0 }
   0x8   : > { %p134_p3 = scmp.eq.s32.totalorder %s453_s20, 1  ;;  %p454_p5 = scmp.ge.s32.totalorder %s738_s18, 1 }
   0x9   : > { %p803_p4 = por %p989_p1, %p62_p0  ;;  %p141_p7 = scmp.lt.s32.totalorder %s738_s18, 3 }
   0xa   : > { %p808_p6 = por %p134_p3, %p62_p0  ;;  %s740_s24 = smov [#allocation2]  }
   0xb   : > { %s992_s21 = scalar_select %p803_p4, 1, 0 }
   0xc   : > { %s993_s22 = scalar_select %p808_p6, 1, 0 }
   0xd   : > { %p813_p8 = pnand %p454_p5, %p141_p7  ;;  %s153_s25 = sshll.u32 %s740_s24, 4  ;;  %s817_s25 = int_to_ptr.vmem [resolvable:$true] %s153_s25 }
   0xe   : > { %s829_s27 = sadd.s32 1, %s738_s18   ;;  %s49_s28 = sadd.s32 1, %s734_s17 }
   0xf   : > { %s994_s23 = scalar_select %p813_p8, 1, 0 }
  0x10   : > { %p552_p9 = pneg %p813_p8  ;;  %s46_s29 = ssub.s32 %s738_s18, %s829_s27 }
  0x11   : > { %s610_s6 = scalar_lea.hbm %s984_s0, 2048 }
  0x12   : > { %p824_p11 = pnand %p552_p9, %p989_p1  ;;  %p611_p12 = scmp.ne.s32.totalorder %s984_s0, %s610_s6 }
  0x13   : > { %p617_p5 = scmp.lt.u32.totalorder %s610_s6, %s984_s0 }
  0x14   : > { %p612_p13 = pneg %p824_p11 }
  0x16   : > { %p613_p0 = pnand %p612_p13, %p611_p12 }
  0x18   : > { %p614_p3 = pneg %p613_p0 }
  0x1a   : > { %p619_p7 = pnand %p617_p5, %p614_p3 }
  0x1c   : > { %622 = shalt.err (!%p619_p7)
}
  0x1d   : > { %s623_s11 = scalar_lea.vmem %s817_s25, 2048  ;;  %p631_p2 = scmp.lt.s32.totalorder %s817_s25, %s817_s25 }
  0x1e   : > { %p624_p9 = scmp.ne.s32.totalorder %s817_s25, %s623_s11  ;;  %p632_p6 = scmp.lt.s32.totalorder %s623_s11, %s623_s11 }
  0x20   : > { %p626_p10 = pnand %p624_p9, %p612_p13  ;;  %p633_p4 = por %p632_p6, %p631_p2 }
  0x22   : > { %p627_p1 = pneg %p626_p10 }
  0x24   : > { %p634_p8 = pnand %p633_p4, %p627_p1 }
  0x26   : > { %637 = shalt.err (!%p634_p8)
}
  0x27   : > { %s741_s12 = smov 128   ;;  %s742_s13 = smov 8  }
  0x28   : > { %555 = dma.hbm_to_vmem [thread:$0]  (!%p824_p11), %s984_s0, 2048, %s817_s25, [#allocation3], %s741_s12, %s741_s12, %s742_s13  }
  0x29   : > { %p47_p2 = scmp.eq.s32.totalorder %s46_s29, 0  ;;  %p56_p1 = scmp.ne.s32.totalorder %s734_s17, %s730_s16 }
  0x2a   : > { %p57_p4 = scmp.eq.s32.totalorder %s738_s18, 0  ;;  %p565_p6 = scmp.lt.s32.totalorder %s738_s18, 2 }
  0x2b   : > { %s860_s24 = scalar_select %p47_p2, %s734_s17, %s49_s28  }
  0x2c   : > { %p58_p8 = por %p57_p4, %p56_p1  ;;  %p996_p10 = scmp.eq.s32.totalorder %s794_s19, 1 }
  0x2d   : > { %s173_s5 = sand.u32 1, %s734_s17   ;;  %s458_s6 = sshll.u32 %s738_s18, 7 }
  0x2e   : > { %p864_p12 = por %p996_p10, %p56_p1  ;;  %s457_s7 = sshll.u32 %s173_s5, 3 }
  0x2f   : > { %s873_s9 = scalar_lea.hbm %s985_s1, %s458_s6  ;;  %s177_s25 = scalar_lea.vmem [#allocation5], %s457_s7 }
  0x30   : > { %s184_s28 = sshll.u32 %s177_s25, 4  ;;  %p875_p11 = pnand %p565_p6, %p58_p8  ;;  %s879_s28 = int_to_ptr.vmem [resolvable:$true] %s184_s28 }
  0x31   : > { %s174_s10 = scalar_lea.sflag [#allocation6], %s173_s5  ;;  %s638_s11 = scalar_lea.hbm %s873_s9, 128 }
  0x32   : > { %p639_p13 = scmp.ne.s32.totalorder %s873_s9, %s638_s11  ;;  %p640_p0 = pneg %p875_p11 }
  0x33   : > { %s643_s14 = scalar_lea.hbm %s985_s1, 256  ;;  %p644_p7 = scmp.lt.u32.totalorder %s873_s9, %s985_s1 }
  0x34   : > { %p641_p3 = pnand %p640_p0, %p639_p13  ;;  %p645_p9 = scmp.lt.u32.totalorder %s643_s14, %s638_s11 }
  0x35   : > { %p647_p1 = scmp.lt.u32.totalorder %s638_s11, %s873_s9 }
  0x36   : > { %p642_p5 = pneg %p641_p3  ;;  %p646_p2 = por %p645_p9, %p644_p7 }
  0x38   : > { %p648_p4 = por %p647_p1, %p646_p2 }
  0x3a   : > { %p649_p6 = pnand %p648_p4, %p642_p5 }
  0x3c   : > { %652 = shalt.err (!%p649_p6)
}
  0x3d   : > { %s653_s5 = scalar_lea.vmem %s879_s28, 128  ;;  %s743_s7 = smov [#allocation5]  }
  0x3e   : > { %p654_p8 = scmp.ne.s32.totalorder %s879_s28, %s653_s5  ;;  %s658_s26 = sshll.u32 %s743_s7, 4  ;;  %s659_s26 = int_to_ptr.vmem [resolvable:$false] %s658_s26 }
  0x3f   : > { %s660_s8 = scalar_lea.vmem %s659_s26, 256  ;;  %p661_p3 = scmp.lt.s32.totalorder %s879_s28, %s659_s26 }
  0x40   : > { %p656_p10 = pnand %p654_p8, %p640_p0  ;;  %p662_p7 = scmp.lt.s32.totalorder %s660_s8, %s653_s5 }
  0x42   : > { %p657_p13 = pneg %p656_p10  ;;  %p663_p9 = por %p662_p7, %p661_p3 }
  0x44   : > { %p664_p2 = pnand %p663_p9, %p657_p13 }
  0x46   : > { %667 = shalt.err (!%p664_p2)
}
  0x47   : > { %559 = dma.hbm_to_vmem [thread:$0]  (!%p875_p11), %s873_s9, 128, %s879_s28, %s174_s10  }
  0x48   : > { %p999_p5 = scmp.ne.s32.totalorder %s994_s23, 0 }
  0x49   : > { %p1000_p0 = scmp.eq.s32.totalorder (!%p999_p5), %s794_s19, 0 }
  0x4a   : > { %193 = sbr.rel (%p999_p5) target bundleno = 531 (0x213), region = 36 }
  0x51   : > { %713 = dma.done.wait (%p1000_p0), [#allocation3], 2048   ;;  %p1001_p1 = pmov %p1000_p0 }
  0x52   : > { %s913_s25 = sand.u32 1, %s730_s16   ;;  %p1002_p11 = scmp.ne.s32.totalorder %s992_s21, 0 }
  0x53   : > { %715 = vsyncadd (%p1001_p1), [#allocation3], 4294965248  ;;  %s461_s29 = sshll.u32 %s913_s25, 3  ;;  %s200_s11 = scalar_lea.sflag [#allocation6], %s913_s25 }
  0x54   : > { %s203_s9 = scalar_lea.vmem [#allocation5], %s461_s29 }
  0x55   : > { %717 = dma.done.wait (%p1002_p11), %s200_s11, 128  }
  0x56   : > { %719 = vsyncadd (%p1002_p11), %s200_s11, 4294967168  ;;  %v744_v0 = vmov 0.0|0.0   ;;  %vm745_vm0 = vmmov 0   ;;  %v746_v1 = vmov 0.0   ;;  %v236_v2 = vld [vmem:[#allocation2] sm:$0xff]  ;;  %v237_v3 = vld [vmem:[#allocation2 + $0x8] sm:$0xff]  ;;  %v342_v45 = vlaneseq }
  0x57   : > { %520 = vmatprep.subr.bf16.mxu0 %v744_v0  ;;  %517 = vmatprep.mubr.msk.f32.mxu0 %vm745_vm0, %v746_v1  ;;  %v238_v4 = vld [vmem:[#allocation2 + $0x10] sm:$0xff]  ;;  %v521_v5 = vpack.c.bf16 %v237_v3, %v236_v2  ;;  %v239_v6 = vld [vmem:[#allocation2 + $0x18] sm:$0xff]  ;;  %v240_v8 = vld [vmem:[#allocation2 + $0x20] sm:$0xff]  ;;  %vm329_vm2 = vcmask 1040384   ;;  %s465_s12 = sshll.u32 %s794_s19, 7  ;;  %s227_s13 = scalar_lea.vmem [#allocation7], %s461_s29 }
  0x58   : > { %v524_v7 = vpack.c.bf16 %v239_v6, %v238_v4  ;;  %v241_v9 = vld [vmem:[#allocation2 + $0x28] sm:$0xff]  ;;  %v242_v13 = vld [vmem:[#allocation2 + $0x30] sm:$0xff]  ;;  %v243_v14 = vld [vmem:[#allocation2 + $0x38] sm:$0xff]  ;;  %v343_v46 = vshrl.u32 %v342_v45, 7  ;;  %s371_s14 = sshll.u32 %s227_s13, 4  ;;  %s940_s5 = scalar_lea.hbm %s988_s4, %s465_s12  ;;  %s942_s14 = int_to_ptr.vmem [resolvable:$true] %s371_s14 }
  0x59   : > { %522 = vmatpush3.bf16.msra.mxu0 %v521_v5  ;;  %v923_v10 = vld [vmem:[%s203_s9] sm:$0xff]  ;;  %v527_v12 = vpack.c.bf16 %v241_v9, %v240_v8  ;;  %v530_v16 = vpack.c.bf16 %v243_v14, %v242_v13  ;;  %v246_v21 = vld [vmem:[#allocation2 + $0x50] sm:$0xff]  ;;  %v247_v22 = vld [vmem:[#allocation2 + $0x58] sm:$0xff]  ;;  %s358_s7 = scalar_lea.sflag [#allocation4], %s913_s25  ;;  %s668_s26 = scalar_lea.vmem %s942_s14, 128 }
  0x5a   : > { %523 = vmatprep.subr.bf16.mxu0 %v744_v0  ;;  %v229_v11 = vmul.f32 %v923_v10, %v923_v10  ;;  %v244_v17 = vld [vmem:[#allocation2 + $0x40] sm:$0xff]  ;;  %v245_v18 = vld [vmem:[#allocation2 + $0x48] sm:$0xff]  ;;  %v536_v24 = vpack.c.bf16 %v247_v22, %v246_v21  ;;  %v250_v29 = vld [vmem:[#allocation2 + $0x70] sm:$0xff]  ;;  %v344_v51 = vsub.s32 0, %v343_v46  ;;  %p669_p4 = scmp.ne.s32.totalorder %s942_s14, %s668_s26  ;;  %s747_s19 = smov [#allocation7]  }
  0x5b   : > { %v533_v20 = vpack.c.bf16 %v245_v18, %v244_v17  ;;  %v248_v25 = vld [vmem:[#allocation2 + $0x60] sm:$0xff]  ;;  %v249_v26 = vld [vmem:[#allocation2 + $0x68] sm:$0xff]  ;;  %v251_v30 = vld [vmem:[#allocation2 + $0x78] sm:$0xff]  ;;  %s672_s8 = sshll.u32 %s747_s19, 4  ;;  %s673_s8 = int_to_ptr.vmem [resolvable:$false] %s672_s8 }
  0x5c   : > { %v230_v15 = vrot.slane %v229_v11, 4  ;;  %v539_v28 = vpack.c.bf16 %v249_v26, %v248_v25  ;;  %v542_v32 = vpack.c.bf16 %v251_v30, %v250_v29  ;;  %v338_v48 = vld [vmem:[%s986_s2] sm:$0x1]  ;;  %p670_p6 = pnand %p669_p4, %p864_p12  ;;  %s674_s29 = scalar_lea.vmem %s673_s8, 256 }
  0x5d   : > { %525 = vmatpush3.bf16.msra.mxu0 %v524_v7  ;;  %v463_v54 = vld [vmem:[%s987_s3] ss:$0 sm:$0xff]  ;;  %p675_p10 = scmp.lt.s32.totalorder %s942_s14, %s673_s8  ;;  %p676_p13 = scmp.lt.s32.totalorder %s674_s29, %s668_s26 }
  0x5e   : > { %526 = vmatprep.subr.bf16.mxu0 %v744_v0  ;;  %v231_v19 = vadd.f32 %v230_v15, %v229_v11  ;;  %p671_p8 = pneg %p670_p6 }
  0x5f   : > { %p677_p3 = por %p676_p13, %p675_p10 }
  0x60   : > { %v232_v23 = vrot.slane %v231_v19, 2 }
  0x61   : > { %528 = vmatpush3.bf16.msra.mxu0 %v527_v12  ;;  %p678_p7 = pnand %p677_p3, %p671_p8 }
  0x62   : > { %529 = vmatprep.subr.bf16.mxu0 %v744_v0  ;;  %v233_v27 = vadd.f32 %v232_v23, %v231_v19 }
  0x64   : > { %v234_v31 = vrot.slane %v233_v27, 1 }
  0x65   : > { %531 = vmatpush3.bf16.msra.mxu0 %v530_v16 }
  0x66   : > { %532 = vmatprep.subr.bf16.mxu0 %v744_v0  ;;  %v235_v33 = vadd.f32 %v234_v31, %v233_v27 }
  0x69   : > { %534 = vmatpush3.bf16.msra.mxu0 %v533_v20 }
  0x6a   : > { %535 = vmatprep.subr.bf16.mxu0 %v744_v0 }
  0x6d   : > { %537 = vmatpush3.bf16.msra.mxu0 %v536_v24 }
  0x6e   : > { %538 = vmatprep.subr.bf16.mxu0 %v744_v0 }
  0x71   : > { %540 = vmatpush3.bf16.msra.mxu0 %v539_v28 }
  0x72   : > { %541 = vmatprep.subr.bf16.mxu0 %v744_v0 }
  0x75   : > { %543 = vmatpush3.bf16.msra.mxu0 %v542_v32 }
  0x78   : > { %518 = vmatmul.mubr.f32.vlgmr.msra.gmra.mrb[0].mxu0 %v235_v33 }
 0x14b   : > { %v318_v34 = vpop.f32.mrb[0].mxu0 }
 0x14c   : > { %606 = vrsqrt.f32 %v318_v34  ;;  %v519_v35 = vpop.f32.mrb[1].mxu0  ;;  %vm324_vm1 = vcmp.eq.f32.partialorder %v318_v34, inf  ;;  %v327_v38 = vand.u32 2147483648, %v318_v34  ;;  %vm326_vm3 = vcmp.eq.f32.partialorder %v318_v34, 0.0 }
 0x156   : > { %v607_v36 = vpop.eup %606 }
 0x157   : > { %v323_v37 = vmul.f32 %v607_v36, %v318_v34 }
 0x159   : > { %v325_v39 = vsel %vm324_vm1, %v318_v34, %v323_v37 }
 0x15a   : > { %v328_v40 = vsel %vm326_vm3, %v327_v38, %v325_v39 }
 0x15b   : > { %v330_v41 = vsel %vm329_vm2, %v328_v40, 0.0 }
 0x15c   : > { %331 = vadd.xlane.f32.xlu0 %v330_v41 }
 0x1e9   : > { %v332_v42 = vpop.xlane.xlu0 %331 }
 0x1ea   : > { %v334_v43 = vmul.f32 0.0078125, %v332_v42 }
 0x1ec   : > { %v335_v44 = vadd.f32 1e-06, %v334_v43 }
 0x1ee   : > { %608 = vrcp.f32 %v335_v44 }
 0x1f8   : > { %v609_v47 = vpop.eup %608 }
 0x1f9   : > { %v337_v49 = vmul.f32 %v609_v47, %v328_v40 }
 0x1fb   : > { %v339_v50 = vmul.f32 %v338_v48, %v337_v49 }
 0x1fd   : > { %v340_v52 = vadd.f32 1.0, %v339_v50 }
 0x1ff   : > { %v345_v53 = vrot.slane %v340_v52, %v344_v51 }
 0x201   : > { %v347_v55 = vmul.f32 %v345_v53, %v923_v10 }
 0x203   : > { %v355_v56 = vadd.f32 %v463_v54, %v347_v55 }
 0x205   : > { %356 = vst [vmem:[%s227_s13] sm:$0xff] %v355_v56 }
 0x206   : > { %681 = shalt.err (!%p678_p7)
}
 0x207   : > { %s682_s25 = scalar_lea.hbm %s940_s5, 128  ;;  %s686_s21 = scalar_lea.hbm %s988_s4, 256 }
 0x208   : > { %p683_p9 = scmp.ne.s32.totalorder %s940_s5, %s682_s25  ;;  %p687_p0 = scmp.lt.u32.totalorder %s940_s5, %s988_s4 }
 0x209   : > { %p688_p1 = scmp.lt.u32.totalorder %s686_s21, %s682_s25  ;;  %p690_p4 = scmp.lt.u32.totalorder %s682_s25, %s940_s5 }
 0x20a   : > { %p684_p2 = pnand %p683_p9, %p864_p12 }
 0x20b   : > { %p689_p11 = por %p688_p1, %p687_p0 }
 0x20c   : > { %p685_p5 = pneg %p684_p2 }
 0x20d   : > { %p691_p6 = por %p690_p4, %p689_p11 }
 0x20f   : > { %p692_p8 = pnand %p691_p6, %p685_p5 }
 0x211   : > { %695 = shalt.err (!%p692_p8)
}
 0x212   : > { %550 = dma.vmem_to_hbm [thread:$0]  (%p864_p12), %s942_s14, 128, %s940_s5, %s358_s7  }
 0x213 PF: > { %s383_s10 = sand.u32 1, %s726_s15   ;;  %p1003_p10 = scmp.ne.s32.totalorder %s993_s22, 0 }
 0x214   : > { %p1004_p13 = scmp.ge.s32.totalorder %s738_s18, 2  ;;  %s384_s12 = scalar_lea.sflag [#allocation4], %s383_s10 }
 0x216   : > { %p561_p3 = pnand %p1004_p13, %p1003_p10 }
 0x218   : > { %721 = dma.done.wait (!%p561_p3), %s384_s12, 128  }
 0x219   : > { %723 = vsyncadd (!%p561_p3), %s384_s12, 4294967168  ;;  %p18_p7 = scmp.ge.s32.totalorder %s829_s27, 4   ;;  %s1005_s15 = smov %s730_s16 }
 0x21a   : > { %s1006_s16 = smov %s734_s17  ;;  %s1007_s17 = smov %s860_s24 }
 0x21b   : > { %s1008_s18 = smov %s829_s27  ;;  %20 = sbr.rel (!%p18_p7) target bundleno = 6 (0x6), region = 86 }
 0x222   :  { %389 = vsyncpa [#allocation3], 1 }
 0x223   :  { %391 = vsyncpa [#allocation3 + $0x1], 1 }
 0x224   :  { %392 = vsyncpa [#allocation6], 1 }
 0x225   :  { %394 = vsyncpa [#allocation6 + $0x1], 1 }
 0x226   :  { %395 = vsyncpa [#allocation4], 1 }
 0x227   :  { %397 = vsyncpa [#allocation4 + $0x1], 1 }

</bundles_post_ra>
